<compile_context>
chip_gen: v7x
topology: tpu7x:2x2x1
jax: 0.10.0
libtpu: 0.0.40
codegen_flags: <defaults>
</compile_context>

<pallas_src>
import jax
import jax.numpy as jnp
from jax import lax
from jax.experimental import pallas as pl
from jax.experimental.pallas import tpu as pltpu


def _make_kernel(B):
    def kernel(sx_ref, sy_ref, x_ref, o_ref):
        # x_ref / o_ref block: (B, c, h, w).
        # sx_ref / sy_ref: flat (n,) int32 in SMEM, values in [-pad, pad].
        _, c, h, w = x_ref.shape
        g = pl.program_id(0)
        for b in range(B):                       # B is small & static -> unrolled
            i = g * B + b
            sx = sx_ref[i]                       # column (W) shift
            sy = sy_ref[i]                       # row    (H) shift

            # Clamped one-hot column-selection matrix (replicate-pad semantics):
            #   sel_w[j, xo] = 1  iff  j == clip(xo + sx, 0, w-1)
            j_idx = lax.broadcasted_iota(jnp.int32, (w, w), 0)
            xo_idx = lax.broadcasted_iota(jnp.int32, (w, w), 1)
            sel_w = (j_idx == jnp.clip(xo_idx + sx, 0, w - 1)).astype(jnp.float32)

            # Clamped one-hot row-selection matrix:
            #   sel_h[yo, iy] = 1  iff  iy == clip(yo + sy, 0, h-1)
            yo_idx = lax.broadcasted_iota(jnp.int32, (h, h), 0)
            iy_idx = lax.broadcasted_iota(jnp.int32, (h, h), 1)
            sel_h = (iy_idx == jnp.clip(yo_idx + sy, 0, h - 1)).astype(jnp.float32)

            xb = x_ref[b].astype(jnp.float32)                     # (c, h, w)

            # W selection: fold c*h into M -> one 2-D MXU matmul.
            a = jnp.dot(xb.reshape(c * h, w), sel_w,
                        preferred_element_type=jnp.float32).reshape(c, h, w)

            # H selection: (h, h) @ (c, h, w) broadcasts over channels.
            # Exact: every output element is a single selected input element.
            out = jnp.matmul(sel_h, a, preferred_element_type=jnp.float32)

            o_ref[b] = out.astype(o_ref.dtype)

    return kernel


def _largest_divisor_le(n, cap):
    for b in range(min(n, cap), 0, -1):
        if n % b == 0:
            return b
    return 1


def random_shifts_aug(x, pad, key):
    n, c, h, w = x.shape
    assert h == w

    # Random integer pixel shifts — exactly what the PyTorch module draws
    # (shift * 2/(h+2p) added to the align_corners=False base grid hits exact
    # integer pixel centers, so bilinear sampling == integer crop of the
    # replicate-padded image).
    shift_int = jax.random.randint(key, (n, 2), 0, 2 * pad + 1, dtype=jnp.int32)

    # Center shifts to [-pad, pad] and pass them as two flat 1-D SMEM tables
    # (flat 1-D avoids the 128-word-per-row SMEM padding of a 2-D table).
    sx_flat = shift_int[:, 0] - pad
    sy_flat = shift_int[:, 1] - pad

    # Batch-block the grid to amortize per-grid-step overhead, under a VMEM
    # budget (in + out blocks are each double-buffered by the pipeline).
    per_img = c * h * w * x.dtype.itemsize
    b_cap = max(1, min(8, (4 * 1024 * 1024) // max(per_img, 1)))
    B = _largest_divisor_le(n, b_cap)
    grid = (n // B,)

    out = pl.pallas_call(
        _make_kernel(B),
        out_shape=jax.ShapeDtypeStruct((n, c, h, w), x.dtype),
        grid_spec=pltpu.PrefetchScalarGridSpec(
            num_scalar_prefetch=2,               # sx, sy tables live in SMEM
            grid=grid,
            in_specs=[pl.BlockSpec((B, c, h, w), lambda g, sx, sy: (g, 0, 0, 0))],
            out_specs=pl.BlockSpec((B, c, h, w), lambda g, sx, sy: (g, 0, 0, 0)),
        ),
        compiler_params=pltpu.CompilerParams(
            dimension_semantics=("parallel",),   # batch blocks shard across TCs
            vmem_limit_bytes=32 * 1024 * 1024,   # safe on v5e/v6e/v7x
        ),
    )(sx_flat, sy_flat, x)
    return out, shift_int


if __name__ == "__main__":
    import numpy as np

    key = jax.random.PRNGKey(0)
    k_x, k_shift = jax.random.split(key)

    n, c, h, w = 2, 4, 16, 16
    pad = 4
    x = jax.random.normal(k_x, (n, c, h, w), dtype=jnp.float32)

    out, shift_int = random_shifts_aug(x, pad, k_shift)
    out = jax.block_until_ready(out)
    assert out.shape == (n, c, h, w) and out.dtype == x.dtype

    # Reference: replicate-pad + integer crop (== the module's bilinear
    # grid_sample, which lands exactly on integer pixel centers).
    x_np = np.asarray(x)
    xp_np = np.pad(x_np, ((0, 0), (0, 0), (pad, pad), (pad, pad)), mode="edge")
    sh = np.asarray(shift_int)
    ref = np.stack(
        [xp_np[i, :, sh[i, 1]:sh[i, 1] + h, sh[i, 0]:sh[i, 0] + w]
         for i in range(n)]
    )
    np.testing.assert_allclose(np.asarray(out), ref, atol=1e-3, rtol=1e-3)

    print("KERNEL_OK")
</pallas_src>

<mosaic_0001>
module attributes {stable_mosaic.version = 11 : i64} {
  func.func @kernel(%arg0: i32, %arg1: memref<2xi32, #tpu.memory_space<smem>>, %arg2: memref<2xi32, #tpu.memory_space<smem>>, %arg3: memref<2x4x16x16xf32, #tpu.memory_space<vmem>>, %arg4: memref<2x4x16x16xf32, #tpu.memory_space<vmem>>) attributes {dimension_semantics = [#tpu.dimension_semantics<parallel>], iteration_bounds = array<i64: 1>, scalar_prefetch = 2 : i64, scratch_operands = 0 : i64, tpu.core_type = #tpu.core_type<tc>, window_params = [{transform_indices = @transform_0, window_bounds = array<i64: 2, 4, 16, 16>}, {transform_indices = @transform_1, window_bounds = array<i64: 2, 4, 16, 16>}]} {
    %c2_i32 = arith.constant 2 : i32
    %0 = arith.muli %arg0, %c2_i32 : i32
    %c0_i32 = arith.constant 0 : i32
    %1 = arith.addi %0, %c0_i32 : i32
    %2 = arith.index_cast %1 : i32 to index
    %3 = memref.load %arg1[%2] : memref<2xi32, #tpu.memory_space<smem>>
    %4 = arith.index_cast %1 : i32 to index
    %5 = memref.load %arg2[%4] : memref<2xi32, #tpu.memory_space<smem>>
    %6 = tpu.iota {dimensions = array<i32: 0>} : vector<16x16xi32>
    %7 = tpu.iota {dimensions = array<i32: 1>} : vector<16x16xi32>
    %8 = vector.broadcast %3 : i32 to vector<16x16xi32>
    %9 = arith.addi %7, %8 : vector<16x16xi32>
    %c0_i32_0 = arith.constant 0 : i32
    %c15_i32 = arith.constant 15 : i32
    %10 = vector.broadcast %c0_i32_0 : i32 to vector<16x16xi32>
    %11 = arith.maxsi %10, %9 : vector<16x16xi32>
    %12 = vector.broadcast %c15_i32 : i32 to vector<16x16xi32>
    %13 = arith.minsi %12, %11 : vector<16x16xi32>
    %14 = arith.cmpi eq, %6, %13 : vector<16x16xi32>
    %15 = arith.extui %14 : vector<16x16xi1> to vector<16x16xi32>
    %16 = arith.sitofp %15 : vector<16x16xi32> to vector<16x16xf32>
    %17 = tpu.iota {dimensions = array<i32: 0>} : vector<16x16xi32>
    %18 = tpu.iota {dimensions = array<i32: 1>} : vector<16x16xi32>
    %19 = vector.broadcast %5 : i32 to vector<16x16xi32>
    %20 = arith.addi %17, %19 : vector<16x16xi32>
    %c0_i32_1 = arith.constant 0 : i32
    %c15_i32_2 = arith.constant 15 : i32
    %21 = vector.broadcast %c0_i32_1 : i32 to vector<16x16xi32>
    %22 = arith.maxsi %21, %20 : vector<16x16xi32>
    %23 = vector.broadcast %c15_i32_2 : i32 to vector<16x16xi32>
    %24 = arith.minsi %23, %22 : vector<16x16xi32>
    %25 = arith.cmpi eq, %18, %24 : vector<16x16xi32>
    %26 = arith.extui %25 : vector<16x16xi1> to vector<16x16xi32>
    %27 = arith.sitofp %26 : vector<16x16xi32> to vector<16x16xf32>
    %c0 = arith.constant 0 : index
    %c0_3 = arith.constant 0 : index
    %c0_4 = arith.constant 0 : index
    %c0_5 = arith.constant 0 : index
    %28 = vector.load %arg3[%c0, %c0_3, %c0_4, %c0_5] : memref<2x4x16x16xf32, #tpu.memory_space<vmem>>, vector<1x4x16x16xf32>
    %29 = vector.shape_cast %28 : vector<1x4x16x16xf32> to vector<4x16x16xf32>
    %30 = vector.shape_cast %29 : vector<4x16x16xf32> to vector<64x16xf32>
    %cst = arith.constant dense<0.000000e+00> : vector<64x16xf32>
    %31 = tpu.matmul %30, %16, %cst {dimension_numbers = #tpu.dot_dimension_numbers<[1], [0], [0], [1], [0, 0, 1, 1], [], []>} : vector<64x16xf32>, vector<16x16xf32>, vector<64x16xf32> -> vector<64x16xf32>
    %32 = vector.shape_cast %31 : vector<64x16xf32> to vector<4x16x16xf32>
    %cst_6 = arith.constant dense<0.000000e+00> : vector<16x4x16xf32>
    %33 = tpu.matmul %27, %32, %cst_6 {dimension_numbers = #tpu.dot_dimension_numbers<[1], [1], [0], [0, 2], [0, 0, 1, 0, 1, 2], [], []>} : vector<16x16xf32>, vector<4x16x16xf32>, vector<16x4x16xf32> -> vector<16x4x16xf32>
    %34 = tpu.transpose %33, [1, 0, 2] : vector<16x4x16xf32> -> vector<4x16x16xf32>
    %c0_7 = arith.constant 0 : index
    %c0_8 = arith.constant 0 : index
    %c0_9 = arith.constant 0 : index
    %c0_10 = arith.constant 0 : index
    %35 = vector.load %arg4[%c0_7, %c0_8, %c0_9, %c0_10] : memref<2x4x16x16xf32, #tpu.memory_space<vmem>>, vector<1x4x16x16xf32>
    %36 = vector.shape_cast %35 : vector<1x4x16x16xf32> to vector<4x16x16xf32>
    %37 = vector.shape_cast %34 : vector<4x16x16xf32> to vector<1x4x16x16xf32>
    tpu.vector_store %arg4[%c0_7, %c0_8, %c0_9, %c0_10], %37 {strides = array<i32>} : memref<2x4x16x16xf32, #tpu.memory_space<vmem>>, vector<1x4x16x16xf32>,
    %c2_i32_11 = arith.constant 2 : i32
    %38 = arith.muli %arg0, %c2_i32_11 : i32
    %c1_i32 = arith.constant 1 : i32
    %39 = arith.addi %38, %c1_i32 : i32
    %40 = arith.index_cast %39 : i32 to index
    %41 = memref.load %arg1[%40] : memref<2xi32, #tpu.memory_space<smem>>
    %42 = arith.index_cast %39 : i32 to index
    %43 = memref.load %arg2[%42] : memref<2xi32, #tpu.memory_space<smem>>
    %44 = tpu.iota {dimensions = array<i32: 0>} : vector<16x16xi32>
    %45 = tpu.iota {dimensions = array<i32: 1>} : vector<16x16xi32>
    %46 = vector.broadcast %41 : i32 to vector<16x16xi32>
    %47 = arith.addi %45, %46 : vector<16x16xi32>
    %c0_i32_12 = arith.constant 0 : i32
    %c15_i32_13 = arith.constant 15 : i32
    %48 = vector.broadcast %c0_i32_12 : i32 to vector<16x16xi32>
    %49 = arith.maxsi %48, %47 : vector<16x16xi32>
    %50 = vector.broadcast %c15_i32_13 : i32 to vector<16x16xi32>
    %51 = arith.minsi %50, %49 : vector<16x16xi32>
    %52 = arith.cmpi eq, %44, %51 : vector<16x16xi32>
    %53 = arith.extui %52 : vector<16x16xi1> to vector<16x16xi32>
    %54 = arith.sitofp %53 : vector<16x16xi32> to vector<16x16xf32>
    %55 = tpu.iota {dimensions = array<i32: 0>} : vector<16x16xi32>
    %56 = tpu.iota {dimensions = array<i32: 1>} : vector<16x16xi32>
    %57 = vector.broadcast %43 : i32 to vector<16x16xi32>
    %58 = arith.addi %55, %57 : vector<16x16xi32>
    %c0_i32_14 = arith.constant 0 : i32
    %c15_i32_15 = arith.constant 15 : i32
    %59 = vector.broadcast %c0_i32_14 : i32 to vector<16x16xi32>
    %60 = arith.maxsi %59, %58 : vector<16x16xi32>
    %61 = vector.broadcast %c15_i32_15 : i32 to vector<16x16xi32>
    %62 = arith.minsi %61, %60 : vector<16x16xi32>
    %63 = arith.cmpi eq, %56, %62 : vector<16x16xi32>
    %64 = arith.extui %63 : vector<16x16xi1> to vector<16x16xi32>
    %65 = arith.sitofp %64 : vector<16x16xi32> to vector<16x16xf32>
    %c1 = arith.constant 1 : index
    %c0_16 = arith.constant 0 : index
    %c0_17 = arith.constant 0 : index
    %c0_18 = arith.constant 0 : index
    %66 = vector.load %arg3[%c1, %c0_16, %c0_17, %c0_18] : memref<2x4x16x16xf32, #tpu.memory_space<vmem>>, vector<1x4x16x16xf32>
    %67 = vector.shape_cast %66 : vector<1x4x16x16xf32> to vector<4x16x16xf32>
    %68 = vector.shape_cast %67 : vector<4x16x16xf32> to vector<64x16xf32>
    %cst_19 = arith.constant dense<0.000000e+00> : vector<64x16xf32>
    %69 = tpu.matmul %68, %54, %cst_19 {dimension_numbers = #tpu.dot_dimension_numbers<[1], [0], [0], [1], [0, 0, 1, 1], [], []>} : vector<64x16xf32>, vector<16x16xf32>, vector<64x16xf32> -> vector<64x16xf32>
    %70 = vector.shape_cast %69 : vector<64x16xf32> to vector<4x16x16xf32>
    %cst_20 = arith.constant dense<0.000000e+00> : vector<16x4x16xf32>
    %71 = tpu.matmul %65, %70, %cst_20 {dimension_numbers = #tpu.dot_dimension_numbers<[1], [1], [0], [0, 2], [0, 0, 1, 0, 1, 2], [], []>} : vector<16x16xf32>, vector<4x16x16xf32>, vector<16x4x16xf32> -> vector<16x4x16xf32>
    %72 = tpu.transpose %71, [1, 0, 2] : vector<16x4x16xf32> -> vector<4x16x16xf32>
    %c1_21 = arith.constant 1 : index
    %c0_22 = arith.constant 0 : index
    %c0_23 = arith.constant 0 : index
    %c0_24 = arith.constant 0 : index
    %73 = vector.load %arg4[%c1_21, %c0_22, %c0_23, %c0_24] : memref<2x4x16x16xf32, #tpu.memory_space<vmem>>, vector<1x4x16x16xf32>
    %74 = vector.shape_cast %73 : vector<1x4x16x16xf32> to vector<4x16x16xf32>
    %75 = vector.shape_cast %72 : vector<4x16x16xf32> to vector<1x4x16x16xf32>
    tpu.vector_store %arg4[%c1_21, %c0_22, %c0_23, %c0_24], %75 {strides = array<i32>} : memref<2x4x16x16xf32, #tpu.memory_space<vmem>>, vector<1x4x16x16xf32>,
    return
  }
  func.func @transform_0(%arg0: i32, %arg1: memref<2xi32, #tpu.memory_space<smem>>, %arg2: memref<2xi32, #tpu.memory_space<smem>>) -> (i32, i32, i32, i32) {
    %c0_i32 = arith.constant 0 : i32
    %c0_i32_0 = arith.constant 0 : i32
    %c0_i32_1 = arith.constant 0 : i32
    %c0_i32_2 = arith.constant 0 : i32
    return %arg0, %c0_i32, %c0_i32_0, %c0_i32_1 : i32, i32, i32, i32
  }
  func.func @transform_1(%arg0: i32, %arg1: memref<2xi32, #tpu.memory_space<smem>>, %arg2: memref<2xi32, #tpu.memory_space<smem>>) -> (i32, i32, i32, i32) {
    %c0_i32 = arith.constant 0 : i32
    %c0_i32_0 = arith.constant 0 : i32
    %c0_i32_1 = arith.constant 0 : i32
    %c0_i32_2 = arith.constant 0 : i32
    return %arg0, %c0_i32, %c0_i32_0, %c0_i32_1 : i32, i32, i32, i32
  }
}

</mosaic_0001>

<bundles_post_ra>
// kernel: tpu_custom_call.1
= control target key start
LH: loop header
LB: loop body
LE: loop exit
PB: predicated region body
PF: predicated region fallthrough
CT: control target
= control target key end

     0   :  { %s2419_s0 = inlined_call_operand.hbm [shape: s32[2], index: 0, kind: input, shape index: {}]   ;;  %s2420_s2 = inlined_call_operand.hbm [shape: f32[2,4,16,16], index: 2, kind: input, shape index: {}]   ;;  %s2421_s3 = inlined_call_operand.hbm [shape: f32[2,4,16,16], index: 3, kind: output, shape index: {}]   ;;  %s2422_s1 = inlined_call_operand.vmem [shape: s32[2], index: 1, kind: input, shape index: {}]  }
   0x1   :  { %s1993_s14 = scalar_lea.hbm %s2419_s0, 16 }
   0x2   :  { %p1994_p0 = scmp.ne.s32.totalorder %s2419_s0, %s1993_s14  ;;  %p1997_p1 = scmp.lt.u32.totalorder %s1993_s14, %s2419_s0 }
   0x4   :  { %p1999_p2 = pnand %p1997_p1, %p1994_p0 }
   0x6   :  { %2002 = shalt.err (!%p1999_p2)  }
   0x7   :  { %s2065_s19 = smov [#allocation3]   ;;  %s10_s24 = sshll.u32 %s2422_s1, 4  ;;  %s11_s24 = int_to_ptr.vmem [resolvable:$true] %s10_s24 }
   0x8   :  { %9 = dma.hbm_to_smem %s2419_s0, 16, %s2065_s19, [#allocation2] }
   0x9   :  { %s2003_s25 = scalar_lea.vmem %s11_s24, 16  ;;  %p2008_p4 = scmp.lt.s32.totalorder %s11_s24, %s11_s24 }
   0xa   :  { %p2004_p3 = scmp.ne.s32.totalorder %s11_s24, %s2003_s25  ;;  %p2009_p5 = scmp.lt.s32.totalorder %s2003_s25, %s2003_s25 }
   0xc   :  { %p2010_p6 = por %p2009_p5, %p2008_p4 }
   0xe   :  { %p2011_p7 = pnand %p2010_p6, %p2004_p3 }
  0x10   :  { %2014 = shalt.err (!%p2011_p7)  }
  0x11   :  { %s2066_s26 = smov [#allocation4]  }
  0x12   :  { %13 = dma.vmem_to_smem %s11_s24, 16, %s2066_s26, [#allocation2] }
  0x13   :  { %2059 = dma.done.wait [#allocation2], 32 }
  0x14   :  { %2060 = vsyncadd [#allocation2], 4294967264 }
  0x15   :  { %15 = sfence }
  0x16   :  { %16 = vsyncpa [#allocation6], 0 }
  0x17   :  { %17 = vsyncpa [#allocation7], 0  ;;  %s2067_s0 = smov [#allocation5]   ;;  %s2015_s29 = scalar_lea.hbm %s2420_s2, 2048 }
  0x18   :  { %s23_s27 = sshll.u32 %s2067_s0, 4  ;;  %p2016_p8 = scmp.ne.s32.totalorder %s2420_s2, %s2015_s29  ;;  %s24_s27 = int_to_ptr.vmem [resolvable:$true] %s23_s27 }
  0x19   :  { %p2019_p9 = scmp.lt.u32.totalorder %s2015_s29, %s2420_s2 }
  0x1b   :  { %p2021_p10 = pnand %p2019_p9, %p2016_p8 }
  0x1d   :  { %2024 = shalt.err (!%p2021_p10)
}
  0x1e   :  { %s2025_s7 = scalar_lea.vmem %s24_s27, 2048  ;;  %p2030_p12 = scmp.lt.s32.totalorder %s24_s27, %s24_s27 }
  0x1f   :  { %p2026_p11 = scmp.ne.s32.totalorder %s24_s27, %s2025_s7  ;;  %p2031_p13 = scmp.lt.s32.totalorder %s2025_s7, %s2025_s7 }
  0x21   :  { %p2032_p0 = por %p2031_p13, %p2030_p12 }
  0x23   :  { %p2033_p1 = pnand %p2032_p0, %p2026_p11 }
  0x25   :  { %2036 = shalt.err (!%p2033_p1)
}
  0x26   :  { %s2068_s8 = smov 128   ;;  %s2069_s9 = smov 8  }
  0x27   :  { %29 = dma.hbm_to_vmem [thread:$0]  %s2420_s2, 2048, %s24_s27, [#allocation6], %s2068_s8, %s2068_s8, %s2069_s9  }
  0x28   :  { %2061 = dma.done.wait [#allocation6], 2048  }
  0x29   :  { %2062 = vsyncadd [#allocation6], 4294965248  ;;  %v36_v0 = vlaneseq  ;;  %s34_s12 = sld [smem:[#allocation3]]  ;;  %vm78_vm0 = vcmask 130048   ;;  %v70_v4 = vld [vmem:[#allocation5] sm:$0xff]  ;;  %v71_v10 = vld [vmem:[#allocation5 + $0x8] sm:$0xff] }
  0x2a   :  { %1889 = vmatprep.mubr.msk.f32.mxu0 %vm78_vm0, %v70_v4  ;;  %v2070_v9 = vmov 1.0|1.0   ;;  %v72_v11 = vld [vmem:[#allocation5 + $0x10] sm:$0xff]  ;;  %v73_v12 = vld [vmem:[#allocation5 + $0x18] sm:$0xff]  ;;  %v74_v13 = vld [vmem:[#allocation5 + $0x20] sm:$0xff]  ;;  %s2177_s2 = sld [smem:[#allocation4]] }
  0x2b   :  { %v2131_v1 = vand.u32 127, %v36_v0  ;;  %v2133_v2 = vshrl.u32 %v36_v0, 7  ;;  %v75_v14 = vld [vmem:[#allocation5 + $0x28] sm:$0xff]  ;;  %v76_v15 = vld [vmem:[#allocation5 + $0x30] sm:$0xff]  ;;  %v77_v16 = vld [vmem:[#allocation5 + $0x38] sm:$0xff]  ;;  %s2073_s13 = smov 48  }
  0x2c   :  { %v2071_v19 = vmov 1983009808   ;;  %v2072_v23 = vmov 1934713408   ;;  %s2074_s14 = smov 16   ;;  %s2075_s15 = smov 32  }
  0x2d   :  { %v2138_v6 = vadd.s32 8, %v2133_v2  ;;  %v211_v20 = vunpack.c.l.s4 %v2071_v19  ;;  %v243_v24 = vunpack.c.l.s4 %v2072_v23  ;;  %s1831_s16 = sld [smem:[#allocation3 + $0x1]]  ;;  %vm506_vm13 = vcmask 261120   ;;  %s2077_s18 = smov 112  }
  0x2e   :  { %vm509_vm14 = vcmask 392192   ;;  %s2258_s17 = sld [smem:[#allocation4 + $0x1]]  ;;  %s2078_s19 = smov 96  }
  0x2f   :  { %v41_v3 = vstv %s34_s12  ;;  %v212_v25 = vunpack.c.0.s8 %v211_v20  ;;  %v244_v30 = vunpack.c.0.s8 %v243_v24  ;;  %s2079_s20 = smov 80   ;;  %s2080_s21 = smov [#allocation8]  }
  0x30   :  { %v42_v5 = vadd.s32 %v41_v3, %v2131_v1  ;;  %s1795_s22 = sshll.u32 %s2080_s21, 4  ;;  %s1796_s22 = int_to_ptr.vmem [resolvable:$true] %s1795_s22 }
  0x31   :  { %v2152_v33 = vsub.s32 %v212_v25, %v2133_v2  ;;  %v2155_v38 = vsub.s32 %v244_v30, %v2133_v2  ;;  %s2037_s23 = scalar_lea.vmem %s1796_s22, 2048  ;;  %p2042_p3 = scmp.lt.s32.totalorder %s1796_s22, %s1796_s22 }
  0x32   :  { %vm43_vm1 = vcmp.gt.s32.totalorder %v42_v5, 0  ;;  %p2038_p2 = scmp.ne.s32.totalorder %s1796_s22, %s2037_s23  ;;  %p2043_p4 = scmp.lt.s32.totalorder %s2037_s23, %s2037_s23 }
  0x33   :  { %v44_v7 = vsel %vm43_vm1, %v42_v5, 0 }
  0x34   :  { %vm45_vm2 = vcmp.lt.s32.totalorder %v44_v7, 15  ;;  %p2044_p5 = por %p2043_p4, %p2042_p3 }
  0x35   :  { %v46_v8 = vsel %vm45_vm2, %v44_v7, 15 }
  0x36   :  { %vm47_vm3 = vcmp.eq.s32.totalorder %v2133_v2, %v46_v8  ;;  %vm48_vm4 = vcmp.eq.s32.totalorder %v2138_v6, %v46_v8  ;;  %p2045_p6 = pnand %p2044_p5, %p2038_p2 }
  0x37   :  { %vm1931_vm5 = vmpackc.low %vm48_vm4, %vm47_vm3 }
  0x38   :  { %1932 = vmatprep.subr.msk.bf16.mxu0 %vm1931_vm5, %v2070_v9 }
  0x39   :  { %1934 = vmatpush3.bf16.msk.msra.mxu0 %vm1931_vm5, %v2070_v9 }
  0x3c   :  { %1890 = vmatmul.mubr.msk.f32.vlgmr.msra.gmra.mrb[0].mxu0 %vm78_vm0, %v71_v10 }
  0x3d   :  { %1892 = vmatprep.mubr.msk.f32.mxu0 %vm78_vm0, %v72_v11 }
  0x40   :  { %1893 = vmatmul.mubr.msk.f32.gmra.mrb[2].mxu0 %vm78_vm0, %v73_v12 }
  0x41   :  { %1895 = vmatprep.mubr.msk.f32.mxu0 %vm78_vm0, %v74_v13 }
  0x44   :  { %1896 = vmatmul.mubr.msk.f32.gmra.mrb[4].mxu0 %vm78_vm0, %v75_v14 }
  0x45   :  { %1898 = vmatprep.mubr.msk.f32.mxu0 %vm78_vm0, %v76_v15 }
  0x48   :  { %1899 = vmatmul.mubr.msk.f32.gmra.mrb[6].mxu0 %vm78_vm0, %v77_v16 }
 0x10f   :  { %v1891_v17 = vpop.f32.mrb[0].mxu0 }
 0x110   :  { %v169_v18 = vpop.f32.mrb[1].mxu0 }
 0x113   :  { %v1894_v21 = vpop.f32.mrb[2].mxu0 }
 0x114   :  { %v179_v22 = vpop.f32.mrb[3].mxu0 }
 0x117   :  { %v1897_v26 = vpop.f32.mrb[4].mxu0 }
 0x118   :  { %v276_v27 = vcombine.low %v1891_v17, %v1897_v26  ;;  %v277_v28 = vcombine.high %v1891_v17, %v1897_v26  ;;  %v189_v29 = vpop.f32.mrb[5].mxu0 }
 0x119   :  { %v208_v31 = vcombine.low %v169_v18, %v189_v29  ;;  %v209_v32 = vcombine.high %v169_v18, %v189_v29 }
 0x11a   :  { %v284_v41 = vrot.slane %v276_v27, %v2152_v33  ;;  %v291_v42 = vrot.slane %v277_v28, %v2152_v33 }
 0x11b   :  { %v1900_v34 = vpop.f32.mrb[6].mxu0  ;;  %v216_v45 = vrot.slane %v208_v31, %v2152_v33  ;;  %v223_v46 = vrot.slane %v209_v32, %v2152_v33 }
 0x11c   :  { %v292_v35 = vcombine.low %v1894_v21, %v1900_v34  ;;  %v293_v36 = vcombine.high %v1894_v21, %v1900_v34  ;;  %v199_v37 = vpop.f32.mrb[7].mxu0 }
 0x11d   :  { %v224_v39 = vcombine.low %v179_v22, %v199_v37  ;;  %v225_v40 = vcombine.high %v179_v22, %v199_v37 }
 0x11e   :  { %v300_v43 = vrot.slane %v292_v35, %v2152_v33  ;;  %v307_v44 = vrot.slane %v293_v36, %v2152_v33 }
 0x11f   :  { %v232_v47 = vrot.slane %v224_v39, %v2152_v33  ;;  %v239_v48 = vrot.slane %v225_v40, %v2152_v33 }
 0x120   :  { %v308_v49 = vcombine.low %v284_v41, %v300_v43  ;;  %v309_v50 = vcombine.high %v284_v41, %v300_v43  ;;  %v324_v51 = vcombine.low %v291_v42, %v307_v44  ;;  %v325_v52 = vcombine.high %v291_v42, %v307_v44 }
 0x121   :  { %v240_v53 = vcombine.low %v216_v45, %v232_v47  ;;  %v241_v54 = vcombine.high %v216_v45, %v232_v47  ;;  %v256_v55 = vcombine.low %v223_v46, %v239_v48  ;;  %v257_v56 = vcombine.high %v223_v46, %v239_v48 }
 0x122   :  { %v316_v57 = vrot.slane %v308_v49, %v2155_v38  ;;  %v323_v58 = vrot.slane %v309_v50, %v2155_v38  ;;  %v332_v59 = vrot.slane %v324_v51, %v2155_v38  ;;  %v339_v60 = vrot.slane %v325_v52, %v2155_v38 }
 0x123   :  { %v248_v61 = vrot.slane %v240_v53, %v2155_v38  ;;  %v255_v62 = vrot.slane %v241_v54, %v2155_v38  ;;  %v264_v63 = vrot.slane %v256_v55, %v2155_v38  ;;  %v271_v0 = vrot.slane %v257_v56, %v2155_v38 }
 0x124   :  { %v412_v3 = vcombine.low %v316_v57, %v323_v58  ;;  %v1823_v4 = vcombine.high %v316_v57, %v323_v58  ;;  %v428_v5 = vcombine.low %v332_v59, %v339_v60  ;;  %v1824_v7 = vcombine.high %v332_v59, %v339_v60 }
 0x125   :  { %v344_v8 = vcombine.low %v248_v61, %v255_v62  ;;  %v1821_v10 = vcombine.high %v248_v61, %v255_v62  ;;  %v360_v11 = vcombine.low %v264_v63, %v271_v0  ;;  %v1822_v12 = vcombine.high %v264_v63, %v271_v0 }
 0x126   :  { %v419_v13 = vrot.slane %v412_v3, %v2152_v33  ;;  %v427_v14 = vrot.slane %v1823_v4, %v2152_v33  ;;  %v435_v15 = vrot.slane %v428_v5, %v2152_v33  ;;  %v443_v16 = vrot.slane %v1824_v7, %v2152_v33 }
 0x127   :  { %v351_v17 = vrot.slane %v344_v8, %v2152_v33  ;;  %v359_v18 = vrot.slane %v1821_v10, %v2152_v33  ;;  %v367_v19 = vrot.slane %v360_v11, %v2152_v33  ;;  %v375_v20 = vrot.slane %v1822_v12, %v2152_v33 }
 0x128   :  { %v445_v21 = vcombine.high %v419_v13, %v427_v14  ;;  %v461_v22 = vcombine.high %v435_v15, %v443_v16  ;;  %v444_v23 = vcombine.low %v419_v13, %v427_v14  ;;  %v460_v24 = vcombine.low %v435_v15, %v443_v16 }
 0x129   :  { %v377_v25 = vcombine.high %v351_v17, %v359_v18  ;;  %v393_v26 = vcombine.high %v367_v19, %v375_v20  ;;  %v376_v27 = vcombine.low %v351_v17, %v359_v18  ;;  %v392_v28 = vcombine.low %v367_v19, %v375_v20  ;;  %v969_v20 = vld [vmem:[#allocation5 + $0x40] sm:$0xff] }
 0x12a   :  { %v459_v29 = vrot.slane %v445_v21, %v2155_v38  ;;  %v475_v30 = vrot.slane %v461_v22, %v2155_v38  ;;  %v452_v31 = vrot.slane %v444_v23, %v2155_v38  ;;  %v468_v32 = vrot.slane %v460_v24, %v2155_v38  ;;  %v970_v21 = vld [vmem:[#allocation5 + $0x48] sm:$0xff]  ;;  %v971_v22 = vld [vmem:[#allocation5 + $0x50] sm:$0xff]  ;;  %v972_v23 = vld [vmem:[#allocation5 + $0x58] sm:$0xff] }
 0x12b   :  { %v391_v34 = vrot.slane %v377_v25, %v2155_v38  ;;  %v407_v35 = vrot.slane %v393_v26, %v2155_v38  ;;  %v384_v36 = vrot.slane %v376_v27, %v2155_v38  ;;  %v400_v37 = vrot.slane %v392_v28, %v2155_v38  ;;  %v973_v24 = vld [vmem:[#allocation5 + $0x60] sm:$0xff]  ;;  %v974_v25 = vld [vmem:[#allocation5 + $0x68] sm:$0xff]  ;;  %v975_v26 = vld [vmem:[#allocation5 + $0x70] sm:$0xff] }
 0x12c   :  { %v479_v39 = vcombine.high %v459_v29, %v475_v30  ;;  %v476_v40 = vcombine.low %v452_v31, %v468_v32  ;;  %v477_v41 = vcombine.high %v452_v31, %v468_v32  ;;  %v478_v42 = vcombine.low %v459_v29, %v475_v30 }
 0x12d   :  { %v411_v43 = vcombine.high %v391_v34, %v407_v35  ;;  %v409_v44 = vcombine.high %v384_v36, %v400_v37  ;;  %v408_v45 = vcombine.low %v384_v36, %v400_v37  ;;  %v410_v46 = vcombine.low %v391_v34, %v407_v35 }
 0x12e   :  { %v53_v47 = vstv %s2177_s2  ;;  %v2076_v54 = vmov 0.0   ;;  %v939_v56 = vstv %s1831_s16 }
 0x12f   :  { %v1973_v48 = vpack.i.bf16 %v479_v39, %v411_v43  ;;  %v1963_v49 = vpack.i.bf16 %v477_v41, %v409_v44  ;;  %v1968_v50 = vpack.i.bf16 %v478_v42, %v410_v46  ;;  %v54_v51 = vadd.s32 %v53_v47, %v2133_v2 }
 0x130   :  { %v940_v57 = vadd.s32 %v939_v56, %v2131_v1  ;;  %v55_v58 = vadd.s32 %v53_v47, %v2138_v6  ;;  %v512_v31 = vcombine.low %v2076_v54, %v2076_v54 }
 0x131   :  { %1974 = vrot.lane.b32.xlu1 %v1973_v48, %s2073_s13  ;;  %1964 = vrot.lane.b32.xlu0 %v1963_v49, %s2074_s14  ;;  %vm56_vm6 = vcmp.gt.s32.totalorder %v54_v51, 0 }
 0x132   :  { %v57_v52 = vsel %vm56_vm6, %v54_v51, 0  ;;  %vm941_vm9 = vcmp.gt.s32.totalorder %v940_v57, 0  ;;  %vm58_vm10 = vcmp.gt.s32.totalorder %v55_v58, 0  ;;  %v2229_v35 = vrot.slane %v512_v31, %v2152_v33 }
 0x133   :  { %vm60_vm7 = vcmp.lt.s32.totalorder %v57_v52, 15  ;;  %v942_v59 = vsel %vm941_vm9, %v940_v57, 0  ;;  %v59_v60 = vsel %vm58_vm10, %v55_v58, 0 }
 0x134   :  { %v61_v53 = vsel %vm60_vm7, %v57_v52, 15  ;;  %vm943_vm11 = vcmp.lt.s32.totalorder %v942_v59, 15  ;;  %vm62_vm12 = vcmp.lt.s32.totalorder %v59_v60, 15  ;;  %v520_v43 = vcombine.low %v2229_v35, %v2229_v35 }
 0x135   :  { %1969 = vrot.lane.b32.xlu0 %v1968_v50, %s2075_s15  ;;  %vm64_vm8 = vcmp.eq.s32.totalorder %v2131_v1, %v61_v53  ;;  %v944_v4 = vsel %vm943_vm11, %v942_v59, 15  ;;  %v63_v8 = vsel %vm62_vm12, %v59_v60, 15  ;;  %v521_v51 = vcombine.high %v2229_v35, %v2229_v35 }
 0x136   :  { %v1809_v55 = vsel %vm64_vm8, 1.0, %v2076_v54  ;;  %vm945_vm15 = vcmp.eq.s32.totalorder %v2133_v2, %v944_v4  ;;  %vm946_vm1 = vcmp.eq.s32.totalorder %v2138_v6, %v944_v4  ;;  %vm65_vm2 = vcmp.eq.s32.totalorder %v2131_v1, %v63_v8 }
 0x137   :  { %1905 = vmatprep.mubr.msk.f32.mxu1 %vm78_vm0, %v1809_v55  ;;  %vm1939_vm3 = vmpackc.low %vm946_vm1, %vm945_vm15  ;;  %v1810_v19 = vsel %vm65_vm2, 1.0, %v2076_v54  ;;  %v2234_v50 = vrot.slane %v520_v43, %v2155_v38 }
 0x1a3   :  { %v1965_v61 = vpop.permute.xlu0 %1964  ;;  %v1975_v0 = vpop.permute.xlu1 %1974 }
 0x1a4   :  { %v1967_v62 = vunpack.i.h.bf16 %v1965_v61  ;;  %v1966_v63 = vunpack.i.l.bf16 %v1965_v61  ;;  %v1977_v10 = vunpack.i.h.bf16 %v1975_v0  ;;  %v1976_v11 = vunpack.i.l.bf16 %v1975_v0 }
 0x1a6   :  { %v505_v12 = vsel %vm78_vm0, %v476_v40, %v1967_v62  ;;  %v504_v13 = vsel %vm78_vm0, %v408_v45, %v1966_v63 }
 0x1a7   :  { %v1970_v3 = vpop.permute.xlu0 %1969 }
 0x1a8   :  { %v1972_v5 = vunpack.i.h.bf16 %v1970_v3  ;;  %v1971_v7 = vunpack.i.l.bf16 %v1970_v3 }
 0x1aa   :  { %v507_v14 = vsel %vm506_vm13, %v504_v13, %v1971_v7  ;;  %v508_v15 = vsel %vm506_vm13, %v505_v12, %v1972_v5 }
 0x1ab   :  { %v510_v16 = vsel %vm509_vm14, %v507_v14, %v1976_v11  ;;  %v511_v17 = vsel %vm509_vm14, %v508_v15, %v1977_v10 }
 0x1ac   :  { %v1935_v18 = vpack.c.bf16 %v511_v17, %v510_v16 }
 0x1ae   :  { %1936 = vmatprep.subr.bf16.mxu1 %v1935_v18 }
 0x1af   :  { %1938 = vmatpush3.bf16.msra.mxu1 %v1935_v18 }
 0x1b0   :  { %1940 = vmatprep.subr.msk.bf16.mxu1 %vm1939_vm3, %v2070_v9 }
 0x1b2   :  { %1906 = vmatmul.mubr.msk.f32.vlgmr.msra.gmra.mrb[0].mxu1 %vm78_vm0, %v1810_v19 }
 0x1b3   :  { %1942 = vmatpush3.bf16.msk.msra.mxu1 %vm1939_vm3, %v2070_v9  ;;  %1912 = vmatprep.mubr.msk.f32.mxu1 %vm78_vm0, %v969_v20  ;;  %v976_v9 = vld [vmem:[#allocation5 + $0x78] sm:$0xff] }
 0x1b6   :  { %1913 = vmatmul.mubr.msk.f32.vlgmr.msra.gmra.mrb[2].mxu1 %vm78_vm0, %v970_v21 }
 0x1b7   :  { %1915 = vmatprep.mubr.msk.f32.mxu1 %vm78_vm0, %v971_v22 }
 0x1ba   :  { %1916 = vmatmul.mubr.msk.f32.gmra.mrb[4].mxu1 %vm78_vm0, %v972_v23 }
 0x1bb   :  { %1918 = vmatprep.mubr.msk.f32.mxu1 %vm78_vm0, %v973_v24 }
 0x1be   :  { %1919 = vmatmul.mubr.msk.f32.gmra.mrb[6].mxu1 %vm78_vm0, %v974_v25 }
 0x1bf   :  { %1921 = vmatprep.mubr.msk.f32.mxu1 %vm78_vm0, %v975_v26 }
 0x1c2   :  { %1922 = vmatmul.mubr.msk.f32.gmra.mrb[8].mxu1 %vm78_vm0, %v976_v9 }
 0x285   :  { %v2222_v27 = vpop.f32.mrb[0].mxu1 }
 0x286   :  { %v2224_v28 = vpop.f32.mrb[1].mxu1 }
 0x289   :  { %v1914_v29 = vpop.f32.mrb[2].mxu1 }
 0x28a   :  { %v1067_v30 = vpop.f32.mrb[3].mxu1 }
 0x28d   :  { %v1917_v32 = vpop.f32.mrb[4].mxu1 }
 0x28e   :  { %v1077_v34 = vpop.f32.mrb[5].mxu1 }
 0x291   :  { %v1920_v36 = vpop.f32.mrb[6].mxu1 }
 0x292   :  { %v1174_v37 = vcombine.low %v1914_v29, %v1920_v36  ;;  %v1175_v39 = vcombine.high %v1914_v29, %v1920_v36  ;;  %v1087_v40 = vpop.f32.mrb[7].mxu1 }
 0x293   :  { %v1106_v41 = vcombine.low %v1067_v30, %v1087_v40  ;;  %v1107_v42 = vcombine.high %v1067_v30, %v1087_v40 }
 0x294   :  { %v1182_v52 = vrot.slane %v1174_v37, %v2152_v33  ;;  %v1189_v53 = vrot.slane %v1175_v39, %v2152_v33 }
 0x295   :  { %v1923_v44 = vpop.f32.mrb[8].mxu1  ;;  %v1114_v57 = vrot.slane %v1106_v41, %v2152_v33  ;;  %v1121_v58 = vrot.slane %v1107_v42, %v2152_v33 }
 0x296   :  { %v1190_v45 = vcombine.low %v1917_v32, %v1923_v44  ;;  %v1191_v46 = vcombine.high %v1917_v32, %v1923_v44  ;;  %v1097_v47 = vpop.f32.mrb[9].mxu1 }
 0x297   :  { %v1122_v48 = vcombine.low %v1077_v34, %v1097_v47  ;;  %v1123_v49 = vcombine.high %v1077_v34, %v1097_v47 }
 0x298   :  { %v1198_v55 = vrot.slane %v1190_v45, %v2152_v33  ;;  %v1205_v56 = vrot.slane %v1191_v46, %v2152_v33 }
 0x299   :  { %v1130_v59 = vrot.slane %v1122_v48, %v2152_v33  ;;  %v1137_v60 = vrot.slane %v1123_v49, %v2152_v33 }
 0x29a   :  { %v1206_v61 = vcombine.low %v1182_v52, %v1198_v55  ;;  %v1207_v62 = vcombine.high %v1182_v52, %v1198_v55  ;;  %v1222_v63 = vcombine.low %v1189_v53, %v1205_v56  ;;  %v1223_v0 = vcombine.high %v1189_v53, %v1205_v56 }
 0x29b   :  { %v1138_v3 = vcombine.low %v1114_v57, %v1130_v59  ;;  %v1139_v4 = vcombine.high %v1114_v57, %v1130_v59  ;;  %v1154_v5 = vcombine.low %v1121_v58, %v1137_v60  ;;  %v1155_v7 = vcombine.high %v1121_v58, %v1137_v60 }
 0x29c   :  { %v1214_v8 = vrot.slane %v1206_v61, %v2155_v38  ;;  %v1221_v10 = vrot.slane %v1207_v62, %v2155_v38  ;;  %v1230_v11 = vrot.slane %v1222_v63, %v2155_v38  ;;  %v1237_v12 = vrot.slane %v1223_v0, %v2155_v38 }
 0x29d   :  { %v1146_v13 = vrot.slane %v1138_v3, %v2155_v38  ;;  %v1153_v14 = vrot.slane %v1139_v4, %v2155_v38  ;;  %v1162_v15 = vrot.slane %v1154_v5, %v2155_v38  ;;  %v1169_v16 = vrot.slane %v1155_v7, %v2155_v38 }
 0x29e   :  { %v1310_v17 = vcombine.low %v1214_v8, %v1221_v10  ;;  %v1849_v18 = vcombine.high %v1214_v8, %v1221_v10  ;;  %v1326_v19 = vcombine.low %v1230_v11, %v1237_v12  ;;  %v1850_v20 = vcombine.high %v1230_v11, %v1237_v12 }
 0x29f   :  { %v1242_v21 = vcombine.low %v1146_v13, %v1153_v14  ;;  %v1847_v22 = vcombine.high %v1146_v13, %v1153_v14  ;;  %v1258_v23 = vcombine.low %v1162_v15, %v1169_v16  ;;  %v1848_v24 = vcombine.high %v1162_v15, %v1169_v16 }
 0x2a0   :  { %v1317_v25 = vrot.slane %v1310_v17, %v2152_v33  ;;  %v1325_v26 = vrot.slane %v1849_v18, %v2152_v33  ;;  %v1333_v9 = vrot.slane %v1326_v19, %v2152_v33  ;;  %v1341_v29 = vrot.slane %v1850_v20, %v2152_v33 }
 0x2a1   :  { %v1249_v30 = vrot.slane %v1242_v21, %v2152_v33  ;;  %v1257_v31 = vrot.slane %v1847_v22, %v2152_v33  ;;  %v1265_v32 = vrot.slane %v1258_v23, %v2152_v33  ;;  %v1273_v34 = vrot.slane %v1848_v24, %v2152_v33 }
 0x2a2   :  { %v1343_v36 = vcombine.high %v1317_v25, %v1325_v26  ;;  %v1359_v37 = vcombine.high %v1333_v9, %v1341_v29  ;;  %v1342_v39 = vcombine.low %v1317_v25, %v1325_v26  ;;  %v1358_v40 = vcombine.low %v1333_v9, %v1341_v29 }
 0x2a3   :  { %v1275_v41 = vcombine.high %v1249_v30, %v1257_v31  ;;  %v1291_v42 = vcombine.high %v1265_v32, %v1273_v34  ;;  %v1274_v43 = vcombine.low %v1249_v30, %v1257_v31  ;;  %v1290_v44 = vcombine.low %v1265_v32, %v1273_v34 }
 0x2a4   :  { %v1357_v45 = vrot.slane %v1343_v36, %v2155_v38  ;;  %v1373_v46 = vrot.slane %v1359_v37, %v2155_v38  ;;  %v1350_v47 = vrot.slane %v1342_v39, %v2155_v38  ;;  %v1366_v48 = vrot.slane %v1358_v40, %v2155_v38 }
 0x2a5   :  { %v1289_v49 = vrot.slane %v1275_v41, %v2155_v38  ;;  %v1305_v52 = vrot.slane %v1291_v42, %v2155_v38  ;;  %v1282_v53 = vrot.slane %v1274_v43, %v2155_v38  ;;  %v1298_v55 = vrot.slane %v1290_v44, %v2155_v38 }
 0x2a6   :  { %v1376_v56 = vcombine.low %v1357_v45, %v1373_v46  ;;  %v1374_v57 = vcombine.low %v1350_v47, %v1366_v48  ;;  %v1375_v58 = vcombine.high %v1350_v47, %v1366_v48  ;;  %v1377_v59 = vcombine.high %v1357_v45, %v1373_v46 }
 0x2a7   :  { %v1308_v60 = vcombine.low %v1289_v49, %v1305_v52  ;;  %v1307_v61 = vcombine.high %v1282_v53, %v1298_v55  ;;  %v1306_v62 = vcombine.low %v1282_v53, %v1298_v55  ;;  %v1309_v63 = vcombine.high %v1289_v49, %v1305_v52 }
 0x2a8   :  { %v951_v0 = vstv %s2258_s17  ;;  %v537_v8 = vcombine.high %v2234_v50, %v2234_v50  ;;  %v535_v10 = vrot.slane %v521_v51, %v2155_v38  ;;  %v536_v21 = vcombine.low %v2234_v50, %v2234_v50 }
 0x2a9   :  { %v1983_v3 = vpack.i.bf16 %v1376_v56, %v1308_v60  ;;  %v1978_v4 = vpack.i.bf16 %v1375_v58, %v1307_v61  ;;  %v1988_v5 = vpack.i.bf16 %v1377_v59, %v1309_v63  ;;  %v952_v7 = vadd.s32 %v951_v0, %v2133_v2 }
 0x2aa   :  { %v538_v2 = vcombine.low %v535_v10, %v535_v10  ;;  %v539_v13 = vcombine.high %v535_v10, %v535_v10  ;;  %v953_v35 = vadd.s32 %v951_v0, %v2138_v6 }
 0x2ab   :  { %1984 = vrot.lane.b32.xlu0 %v1983_v3, %s2075_s15  ;;  %1979 = vrot.lane.b32.xlu1 %v1978_v4, %s2074_s14  ;;  %vm954_vm4 = vcmp.gt.s32.totalorder %v952_v7, 0 }
 0x2ac   :  { %v955_v11 = vsel %vm954_vm4, %v952_v7, 0  ;;  %vm956_vm7 = vcmp.gt.s32.totalorder %v953_v35, 0 }
 0x2ad   :  { %vm958_vm5 = vcmp.lt.s32.totalorder %v955_v11, 15  ;;  %v957_v51 = vsel %vm956_vm7, %v953_v35, 0 }
 0x2ae   :  { %v959_v12 = vsel %vm958_vm5, %v955_v11, 15  ;;  %vm960_vm8 = vcmp.lt.s32.totalorder %v957_v51, 15 }
 0x2af   :  { %1989 = vrot.lane.b32.xlu1 %v1988_v5, %s2073_s13  ;;  %541 = vrot.lane.b32.xlu0 %v537_v8, %s2074_s14  ;;  %vm962_vm6 = vcmp.eq.s32.totalorder %v2131_v1, %v959_v12  ;;  %v961_v9 = vsel %vm960_vm8, %v957_v51, 15 }
 0x2b0   :  { %v1835_v14 = vsel %vm962_vm6, 1.0, %v2076_v54  ;;  %vm963_vm9 = vcmp.eq.s32.totalorder %v2131_v1, %v961_v9 }
 0x2b1   :  { %1928 = vmatprep.mubr.msk.f32.mxu0 %vm78_vm0, %v1835_v14  ;;  %v1836_v43 = vsel %vm963_vm9, 1.0, %v2076_v54 }
 0x2b3   :  { %545 = vrot.lane.b32.xlu1 %v538_v2, %s2075_s15  ;;  %549 = vrot.lane.b32.xlu0 %v539_v13, %s2073_s13 }
 0x31d   :  { %v1985_v15 = vpop.permute.xlu0 %1984  ;;  %v1980_v16 = vpop.permute.xlu1 %1979 }
 0x31e   :  { %v1982_v17 = vunpack.i.h.bf16 %v1980_v16  ;;  %v1981_v18 = vunpack.i.l.bf16 %v1980_v16  ;;  %v1987_v19 = vunpack.i.h.bf16 %v1985_v15  ;;  %v1986_v20 = vunpack.i.l.bf16 %v1985_v15 }
 0x320   :  { %v1403_v22 = vsel %vm78_vm0, %v1374_v57, %v1982_v17  ;;  %v1402_v23 = vsel %vm78_vm0, %v1306_v62, %v1981_v18 }
 0x321   :  { %v1990_v24 = vpop.permute.xlu1 %1989  ;;  %v542_v25 = vpop.permute.xlu0 %541  ;;  %v1404_v30 = vsel %vm506_vm13, %v1402_v23, %v1986_v20  ;;  %v1405_v31 = vsel %vm506_vm13, %v1403_v22, %v1987_v19 }
 0x322   :  { %v1992_v26 = vunpack.i.h.bf16 %v1990_v24  ;;  %v1991_v6 = vunpack.i.l.bf16 %v1990_v24  ;;  %v552_v29 = vsel %vm78_vm0, %v536_v21, %v542_v25 }
 0x324   :  { %v1406_v32 = vsel %vm509_vm14, %v1404_v30, %v1991_v6  ;;  %v1407_v50 = vsel %vm509_vm14, %v1405_v31, %v1992_v26 }
 0x325   :  { %v546_v34 = vpop.permute.xlu1 %545  ;;  %v550_v36 = vpop.permute.xlu0 %549  ;;  %v1943_v37 = vpack.c.bf16 %v1407_v50, %v1406_v32 }
 0x326   :  { %v553_v39 = vsel %vm506_vm13, %v552_v29, %v546_v34 }
 0x327   :  { %v2302_v40 = vsel %vm509_vm14, %v553_v39, %v550_v36  ;;  %1944 = vmatprep.subr.bf16.mxu0 %v1943_v37 }
 0x328   :  { %v628_v41 = vadd.f32 %v2224_v28, %v2302_v40  ;;  %v633_v42 = vadd.f32 %v2222_v27, %v2302_v40  ;;  %1946 = vmatpush3.bf16.msra.mxu0 %v1943_v37 }
 0x32a   :  { %640 = vrot.lane.b32.xlu0 %v633_v42, %s2077_s18  ;;  %638 = vrot.lane.b32.xlu1 %v628_v41, %s2077_s18 }
 0x32b   :  { %1929 = vmatmul.mubr.msk.f32.vlgmr.msra.gmra.mrb[8].mxu0 %vm78_vm0, %v1836_v43 }
 0x32e   :  { %646 = vrot.lane.b32.xlu0 %v633_v42, %s2078_s19  ;;  %644 = vrot.lane.b32.xlu1 %v628_v41, %s2078_s19 }
 0x332   :  { %652 = vrot.lane.b32.xlu0 %v633_v42, %s2079_s20  ;;  %650 = vrot.lane.b32.xlu1 %v628_v41, %s2079_s20 }
 0x39c   :  { %v641_v1 = vpop.permute.xlu0 %640  ;;  %v639_v27 = vpop.permute.xlu1 %638 }
 0x3a0   :  { %v647_v54 = vpop.permute.xlu0 %646  ;;  %v645_v28 = vpop.permute.xlu1 %644 }
 0x3a1   :  { %v724_v44 = vcombine.low %v633_v42, %v647_v54  ;;  %v725_v45 = vcombine.high %v633_v42, %v647_v54  ;;  %v656_v46 = vcombine.low %v628_v41, %v645_v28  ;;  %v657_v47 = vcombine.high %v628_v41, %v645_v28 }
 0x3a3   :  { %v732_v57 = vrot.slane %v724_v44, %v2152_v33  ;;  %v739_v58 = vrot.slane %v725_v45, %v2152_v33  ;;  %v664_v63 = vrot.slane %v656_v46, %v2152_v33  ;;  %v671_v0 = vrot.slane %v657_v47, %v2152_v33 }
 0x3a4   :  { %v653_v48 = vpop.permute.xlu0 %652  ;;  %v651_v49 = vpop.permute.xlu1 %650 }
 0x3a5   :  { %v740_v52 = vcombine.low %v641_v1, %v653_v48  ;;  %v741_v53 = vcombine.high %v641_v1, %v653_v48  ;;  %v672_v55 = vcombine.low %v639_v27, %v651_v49  ;;  %v673_v56 = vcombine.high %v639_v27, %v651_v49 }
 0x3a7   :  { %v748_v59 = vrot.slane %v740_v52, %v2152_v33  ;;  %v755_v60 = vrot.slane %v741_v53, %v2152_v33  ;;  %v680_v61 = vrot.slane %v672_v55, %v2152_v33  ;;  %v687_v62 = vrot.slane %v673_v56, %v2152_v33 }
 0x3a9   :  { %v756_v3 = vcombine.low %v732_v57, %v748_v59  ;;  %v757_v4 = vcombine.high %v732_v57, %v748_v59  ;;  %v772_v5 = vcombine.low %v739_v58, %v755_v60  ;;  %v773_v7 = vcombine.high %v739_v58, %v755_v60 }
 0x3aa   :  { %v688_v8 = vcombine.low %v664_v63, %v680_v61  ;;  %v689_v10 = vcombine.high %v664_v63, %v680_v61  ;;  %v704_v11 = vcombine.low %v671_v0, %v687_v62  ;;  %v705_v12 = vcombine.high %v671_v0, %v687_v62 }
 0x3ab   :  { %v764_v2 = vrot.slane %v756_v3, %v2155_v38  ;;  %v771_v13 = vrot.slane %v757_v4, %v2155_v38  ;;  %v780_v14 = vrot.slane %v772_v5, %v2155_v38  ;;  %v787_v35 = vrot.slane %v773_v7, %v2155_v38 }
 0x3ac   :  { %v696_v51 = vrot.slane %v688_v8, %v2155_v38  ;;  %v703_v15 = vrot.slane %v689_v10, %v2155_v38  ;;  %v712_v16 = vrot.slane %v704_v11, %v2155_v38  ;;  %v719_v17 = vrot.slane %v705_v12, %v2155_v38 }
 0x3ad   :  { %v860_v18 = vcombine.low %v764_v2, %v771_v13  ;;  %v1829_v19 = vcombine.high %v764_v2, %v771_v13  ;;  %v876_v20 = vcombine.low %v780_v14, %v787_v35  ;;  %v1830_v21 = vcombine.high %v780_v14, %v787_v35 }
 0x3ae   :  { %v792_v22 = vcombine.low %v696_v51, %v703_v15  ;;  %v1827_v23 = vcombine.high %v696_v51, %v703_v15  ;;  %v808_v24 = vcombine.low %v712_v16, %v719_v17  ;;  %v1828_v25 = vcombine.high %v712_v16, %v719_v17 }
 0x3af   :  { %v867_v26 = vrot.slane %v860_v18, %v2152_v33  ;;  %v875_v6 = vrot.slane %v1829_v19, %v2152_v33  ;;  %v883_v9 = vrot.slane %v876_v20, %v2152_v33  ;;  %v891_v29 = vrot.slane %v1830_v21, %v2152_v33 }
 0x3b0   :  { %v799_v30 = vrot.slane %v792_v22, %v2152_v33  ;;  %v807_v31 = vrot.slane %v1827_v23, %v2152_v33  ;;  %v815_v32 = vrot.slane %v808_v24, %v2152_v33  ;;  %v823_v50 = vrot.slane %v1828_v25, %v2152_v33 }
 0x3b1   :  { %v892_v34 = vcombine.low %v867_v26, %v875_v6  ;;  %v893_v36 = vcombine.high %v867_v26, %v875_v6  ;;  %v908_v37 = vcombine.low %v883_v9, %v891_v29  ;;  %v909_v39 = vcombine.high %v883_v9, %v891_v29 }
 0x3b2   :  { %v824_v41 = vcombine.low %v799_v30, %v807_v31  ;;  %v825_v42 = vcombine.high %v799_v30, %v807_v31  ;;  %v840_v43 = vcombine.low %v815_v32, %v823_v50  ;;  %v841_v1 = vcombine.high %v815_v32, %v823_v50 }
 0x3b3   :  { %v900_v27 = vrot.slane %v892_v34, %v2155_v38  ;;  %v907_v54 = vrot.slane %v893_v36, %v2155_v38  ;;  %v916_v28 = vrot.slane %v908_v37, %v2155_v38  ;;  %v923_v44 = vrot.slane %v909_v39, %v2155_v38 }
 0x3b4   :  { %v832_v45 = vrot.slane %v824_v41, %v2155_v38  ;;  %v839_v46 = vrot.slane %v825_v42, %v2155_v38  ;;  %v848_v47 = vrot.slane %v840_v43, %v2155_v38  ;;  %v855_v48 = vrot.slane %v841_v1, %v2155_v38 }
 0x3b5   :  { %v924_v49 = vcombine.low %v900_v27, %v916_v28  ;;  %v925_v52 = vcombine.high %v900_v27, %v916_v28  ;;  %v926_v53 = vcombine.low %v907_v54, %v923_v44  ;;  %v927_v55 = vcombine.high %v907_v54, %v923_v44 }
 0x3b6   :  { %v856_v56 = vcombine.low %v832_v45, %v848_v47  ;;  %v857_v57 = vcombine.high %v832_v45, %v848_v47  ;;  %v858_v58 = vcombine.low %v839_v46, %v855_v48  ;;  %v859_v59 = vcombine.high %v839_v46, %v855_v48 }
 0x3b7   :  { %929 = vst.msk [vmem:[#allocation8 + $0x8] sm:$0xff] %vm78_vm0, %v924_v49  ;;  %931 = vst.msk [vmem:[#allocation8 + $0x18] sm:$0xff] %vm78_vm0, %v925_v52 }
 0x3b8   :  { %933 = vst.msk [vmem:[#allocation8 + $0x28] sm:$0xff] %vm78_vm0, %v926_v53  ;;  %935 = vst.msk [vmem:[#allocation8 + $0x38] sm:$0xff] %vm78_vm0, %v927_v55 }
 0x3b9   :  { %928 = vst.msk [vmem:[#allocation8] sm:$0xff] %vm78_vm0, %v856_v56  ;;  %930 = vst.msk [vmem:[#allocation8 + $0x10] sm:$0xff] %vm78_vm0, %v857_v57 }
 0x3ba   :  { %932 = vst.msk [vmem:[#allocation8 + $0x20] sm:$0xff] %vm78_vm0, %v858_v58  ;;  %934 = vst.msk [vmem:[#allocation8 + $0x30] sm:$0xff] %vm78_vm0, %v859_v59 }
 0x3fe   :  { %v1930_v60 = vpop.f32.mrb[8].mxu0 }
 0x3ff   :  { %v1486_v61 = vadd.f32 %v1930_v60, %v2302_v40  ;;  %v1480_v62 = vpop.f32.mrb[9].mxu0 }
 0x400   :  { %v1481_v63 = vadd.f32 %v1480_v62, %v2302_v40 }
 0x401   :  { %1493 = vrot.lane.b32.xlu0 %v1486_v61, %s2077_s18 }
 0x402   :  { %1491 = vrot.lane.b32.xlu1 %v1481_v63, %s2077_s18 }
 0x405   :  { %1499 = vrot.lane.b32.xlu0 %v1486_v61, %s2078_s19 }
 0x406   :  { %1497 = vrot.lane.b32.xlu1 %v1481_v63, %s2078_s19 }
 0x409   :  { %1505 = vrot.lane.b32.xlu0 %v1486_v61, %s2079_s20 }
 0x40a   :  { %1503 = vrot.lane.b32.xlu1 %v1481_v63, %s2079_s20 }
 0x473   :  { %v1494_v0 = vpop.permute.xlu0 %1493 }
 0x474   :  { %v1492_v3 = vpop.permute.xlu1 %1491 }
 0x477   :  { %v1500_v4 = vpop.permute.xlu0 %1499 }
 0x478   :  { %v1498_v5 = vpop.permute.xlu1 %1497  ;;  %v1577_v7 = vcombine.low %v1486_v61, %v1500_v4  ;;  %v1578_v8 = vcombine.high %v1486_v61, %v1500_v4 }
 0x479   :  { %v1509_v10 = vcombine.low %v1481_v63, %v1498_v5  ;;  %v1510_v40 = vcombine.high %v1481_v63, %v1498_v5 }
 0x47a   :  { %v1585_v51 = vrot.slane %v1577_v7, %v2152_v33  ;;  %v1592_v15 = vrot.slane %v1578_v8, %v2152_v33 }
 0x47b   :  { %v1506_v11 = vpop.permute.xlu0 %1505  ;;  %v1517_v18 = vrot.slane %v1509_v10, %v2152_v33  ;;  %v1524_v19 = vrot.slane %v1510_v40, %v2152_v33 }
 0x47c   :  { %v1593_v12 = vcombine.low %v1494_v0, %v1506_v11  ;;  %v1594_v2 = vcombine.high %v1494_v0, %v1506_v11  ;;  %v1504_v13 = vpop.permute.xlu1 %1503 }
 0x47d   :  { %v1525_v14 = vcombine.low %v1492_v3, %v1504_v13  ;;  %v1526_v35 = vcombine.high %v1492_v3, %v1504_v13 }
 0x47e   :  { %v1601_v16 = vrot.slane %v1593_v12, %v2152_v33  ;;  %v1608_v17 = vrot.slane %v1594_v2, %v2152_v33 }
 0x47f   :  { %v1533_v20 = vrot.slane %v1525_v14, %v2152_v33  ;;  %v1540_v21 = vrot.slane %v1526_v35, %v2152_v33 }
 0x480   :  { %v1609_v22 = vcombine.low %v1585_v51, %v1601_v16  ;;  %v1610_v23 = vcombine.high %v1585_v51, %v1601_v16  ;;  %v1625_v24 = vcombine.low %v1592_v15, %v1608_v17  ;;  %v1626_v25 = vcombine.high %v1592_v15, %v1608_v17 }
 0x481   :  { %v1541_v26 = vcombine.low %v1517_v18, %v1533_v20  ;;  %v1542_v6 = vcombine.high %v1517_v18, %v1533_v20  ;;  %v1557_v9 = vcombine.low %v1524_v19, %v1540_v21  ;;  %v1558_v29 = vcombine.high %v1524_v19, %v1540_v21 }
 0x482   :  { %v1617_v30 = vrot.slane %v1609_v22, %v2155_v38  ;;  %v1624_v31 = vrot.slane %v1610_v23, %v2155_v38  ;;  %v1633_v32 = vrot.slane %v1625_v24, %v2155_v38  ;;  %v1640_v50 = vrot.slane %v1626_v25, %v2155_v38 }
 0x483   :  { %v1549_v34 = vrot.slane %v1541_v26, %v2155_v38  ;;  %v1556_v36 = vrot.slane %v1542_v6, %v2155_v38  ;;  %v1565_v37 = vrot.slane %v1557_v9, %v2155_v38  ;;  %v1572_v39 = vrot.slane %v1558_v29, %v2155_v38 }
 0x484   :  { %v1713_v41 = vcombine.low %v1617_v30, %v1624_v31  ;;  %v1855_v42 = vcombine.high %v1617_v30, %v1624_v31  ;;  %v1729_v43 = vcombine.low %v1633_v32, %v1640_v50  ;;  %v1856_v1 = vcombine.high %v1633_v32, %v1640_v50 }
 0x485   :  { %v1645_v27 = vcombine.low %v1549_v34, %v1556_v36  ;;  %v1853_v54 = vcombine.high %v1549_v34, %v1556_v36  ;;  %v1661_v28 = vcombine.low %v1565_v37, %v1572_v39  ;;  %v1854_v44 = vcombine.high %v1565_v37, %v1572_v39 }
 0x486   :  { %v1720_v45 = vrot.slane %v1713_v41, %v2152_v33  ;;  %v1728_v46 = vrot.slane %v1855_v42, %v2152_v33  ;;  %v1736_v47 = vrot.slane %v1729_v43, %v2152_v33  ;;  %v1744_v48 = vrot.slane %v1856_v1, %v2152_v33 }
 0x487   :  { %v1652_v49 = vrot.slane %v1645_v27, %v2152_v33  ;;  %v1660_v52 = vrot.slane %v1853_v54, %v2152_v33  ;;  %v1668_v53 = vrot.slane %v1661_v28, %v2152_v33  ;;  %v1676_v55 = vrot.slane %v1854_v44, %v2152_v33 }
 0x488   :  { %v1745_v56 = vcombine.low %v1720_v45, %v1728_v46  ;;  %v1746_v57 = vcombine.high %v1720_v45, %v1728_v46  ;;  %v1761_v58 = vcombine.low %v1736_v47, %v1744_v48  ;;  %v1762_v59 = vcombine.high %v1736_v47, %v1744_v48 }
 0x489   :  { %v1677_v60 = vcombine.low %v1652_v49, %v1660_v52  ;;  %v1678_v61 = vcombine.high %v1652_v49, %v1660_v52  ;;  %v1693_v62 = vcombine.low %v1668_v53, %v1676_v55  ;;  %v1694_v63 = vcombine.high %v1668_v53, %v1676_v55 }
 0x48a   :  { %v1753_v0 = vrot.slane %v1745_v56, %v2155_v38  ;;  %v1760_v3 = vrot.slane %v1746_v57, %v2155_v38  ;;  %v1769_v4 = vrot.slane %v1761_v58, %v2155_v38  ;;  %v1776_v5 = vrot.slane %v1762_v59, %v2155_v38 }
 0x48b   :  { %v1685_v33 = vrot.slane %v1677_v60, %v2155_v38  ;;  %v1692_v7 = vrot.slane %v1678_v61, %v2155_v38  ;;  %v1701_v8 = vrot.slane %v1693_v62, %v2155_v38  ;;  %v1708_v10 = vrot.slane %v1694_v63, %v2155_v38 }
 0x48c   :  { %v1777_v40 = vcombine.low %v1753_v0, %v1769_v4  ;;  %v1778_v11 = vcombine.high %v1753_v0, %v1769_v4  ;;  %v1779_v12 = vcombine.low %v1760_v3, %v1776_v5  ;;  %v1780_v2 = vcombine.high %v1760_v3, %v1776_v5 }
 0x48d   :  { %v1709_v13 = vcombine.low %v1685_v33, %v1701_v8  ;;  %v1710_v14 = vcombine.high %v1685_v33, %v1701_v8  ;;  %v1711_v35 = vcombine.low %v1692_v7, %v1708_v10  ;;  %v1712_v51 = vcombine.high %v1692_v7, %v1708_v10 }
 0x48e   :  { %1783 = vst.msk [vmem:[#allocation8 + $0x48] sm:$0xff] %vm78_vm0, %v1777_v40  ;;  %1785 = vst.msk [vmem:[#allocation8 + $0x58] sm:$0xff] %vm78_vm0, %v1778_v11 }
 0x48f   :  { %1787 = vst.msk [vmem:[#allocation8 + $0x68] sm:$0xff] %vm78_vm0, %v1779_v12  ;;  %1789 = vst.msk [vmem:[#allocation8 + $0x78] sm:$0xff] %vm78_vm0, %v1780_v2 }
 0x490   :  { %1782 = vst.msk [vmem:[#allocation8 + $0x40] sm:$0xff] %vm78_vm0, %v1709_v13  ;;  %1784 = vst.msk [vmem:[#allocation8 + $0x50] sm:$0xff] %vm78_vm0, %v1710_v14 }
 0x491   :  { %1786 = vst.msk [vmem:[#allocation8 + $0x60] sm:$0xff] %vm78_vm0, %v1711_v35  ;;  %1788 = vst.msk [vmem:[#allocation8 + $0x70] sm:$0xff] %vm78_vm0, %v1712_v51 }
 0x492   :  { %2048 = shalt.err (!%p2045_p6)
}
 0x493   :  { %s2049_s26 = scalar_lea.hbm %s2421_s3, 2048 }
 0x494   :  { %p2050_p7 = scmp.ne.s32.totalorder %s2421_s3, %s2049_s26  ;;  %p2053_p8 = scmp.lt.u32.totalorder %s2049_s26, %s2421_s3 }
 0x496   :  { %p2055_p9 = pnand %p2053_p8, %p2050_p7 }
 0x498   :  { %2058 = shalt.err (!%p2055_p9)
}
 0x499   :  { %1801 = dma.vmem_to_hbm [thread:$0]  %s1796_s22, 2048, %s2421_s3, [#allocation7], %s2068_s8, %s2068_s8, %s2069_s9  }
 0x49a   :  { %2063 = dma.done.wait [#allocation7], 2048  }
 0x49b   :  { %2064 = vsyncadd [#allocation7], 4294965248 }
 0x49c   :  { %1805 = vsyncpa [#allocation6], 1 }
 0x49d   :  { %1806 = vsyncpa [#allocation7], 1 }

</bundles_post_ra>
